<compile_context>
chip_gen: v6e
topology: v6e:2x2x1
jax: 0.10.0
libtpu: 0.0.40
codegen_flags: <defaults>
</compile_context>

<pallas_src>
import jax
import jax.numpy as jnp
from jax.experimental import pallas as pl
from jax.experimental.pallas import tpu as pltpu

K_TXT = 768          # XLNet hidden size
K_IMG = 1000         # resnet152 logits (kept at native width, no K pad)
N_HALF = 128         # per-branch projection width
N_HID = 256          # 128 (txt) + 128 (img)
N_OUT = 3
N_OUT_PAD = 128      # lane-dense output


def _cdiv(a, b):
    return -(-a // b)


def _round_up(x, m):
    return _cdiv(x, m) * m


# ----------------------------------------------------------------------------
# Pallas kernel: two projections + relu + fc (split fc, no concat)
# ----------------------------------------------------------------------------
def _fusion_head_kernel(txt_ref, img_ref, wt_ref, bt_ref, wi_ref, bi_ref,
                        w2t_ref, w2i_ref, b2_ref, out_ref):
    # txt projection: [tb, 768](bf16) @ [768, 128](bf16) -> f32 acc
    ht = jnp.dot(txt_ref[...], wt_ref[...], preferred_element_type=jnp.float32)
    ht = jnp.maximum(ht + bt_ref[...], 0.0)
    # img projection: [tb, 1000](bf16) @ [1000, 128](bf16) -> f32 acc
    hi = jnp.dot(img_ref[...], wi_ref[...], preferred_element_type=jnp.float32)
    hi = jnp.maximum(hi + bi_ref[...], 0.0)
    # fc over cat(ht, hi):  cat(ht, hi) @ W2 == ht @ W2[:128] + hi @ W2[128:]
    o = jnp.dot(ht.astype(jnp.bfloat16), w2t_ref[...],
                preferred_element_type=jnp.float32)
    o = o + jnp.dot(hi.astype(jnp.bfloat16), w2i_ref[...],
                    preferred_element_type=jnp.float32)
    out_ref[...] = o + b2_ref[...]


def prepare_head_weights(params):
    """Build kernel-ready (bf16, lane-padded) head weights once."""
    w2 = jnp.zeros((N_HID, N_OUT_PAD), jnp.float32).at[:, :N_OUT].set(params["wf"])
    b2 = jnp.zeros((1, N_OUT_PAD), jnp.float32).at[:, :N_OUT].set(params["bf"])
    return {
        "wt": params["wt"].astype(jnp.bfloat16),     # [768, 128]
        "bt": params["bt"],                          # [1, 128]  (f32, post-matmul)
        "wi": params["wi"].astype(jnp.bfloat16),     # [1000, 128]
        "bi": params["bi"],                          # [1, 128]
        "w2t": w2[:N_HALF].astype(jnp.bfloat16),     # [128, 128] (cols 3.. zero)
        "w2i": w2[N_HALF:].astype(jnp.bfloat16),     # [128, 128]
        "b2": b2,                                    # [1, 128]
    }


def fusion_head(txt_feat, img_feat, head_w, *, block_b=2048):
    """txt_feat: [B,768] f32, img_feat: [B,1000] f32 -> [B,3] f32."""
    B = txt_feat.shape[0]
    # >= 2 grid steps so ("parallel",) shards the batch over both v7x cores;
    # tb sized to minimize padding waste while staying a multiple of 8.
    n_blocks = max(2, _cdiv(B, block_b))
    tb = _round_up(_cdiv(B, n_blocks), 8)
    Bp = tb * n_blocks

    # bf16 cast fuses into the backbone epilogue under jit; no fused-slab copy.
    txt = txt_feat.astype(jnp.bfloat16)
    img = img_feat.astype(jnp.bfloat16)
    if Bp != B:  # batch pad only when the tile grid does not divide B exactly
        txt = jnp.pad(txt, ((0, Bp - B), (0, 0)))
        img = jnp.pad(img, ((0, Bp - B), (0, 0)))

    flops = 2 * Bp * (K_TXT * N_HALF + K_IMG * N_HALF + 2 * N_HALF * N_OUT_PAD)
    bytes_accessed = (
        Bp * (K_TXT + K_IMG) * 2                       # bf16 features in
        + Bp * N_OUT_PAD * 4                           # f32 output out
        + (head_w["wt"].size + head_w["wi"].size
           + head_w["w2t"].size + head_w["w2i"].size) * 2
        + (head_w["bt"].size + head_w["bi"].size + head_w["b2"].size) * 4)

    out = pl.pallas_call(
        _fusion_head_kernel,
        out_shape=jax.ShapeDtypeStruct((Bp, N_OUT_PAD), jnp.float32),
        grid=(n_blocks,),
        in_specs=[
            pl.BlockSpec((tb, K_TXT), lambda i: (i, 0)),          # pipelined
            pl.BlockSpec((tb, K_IMG), lambda i: (i, 0)),          # pipelined
            pl.BlockSpec((K_TXT, N_HALF), lambda i: (0, 0)),      # resident
            pl.BlockSpec((1, N_HALF), lambda i: (0, 0)),          # resident
            pl.BlockSpec((K_IMG, N_HALF), lambda i: (0, 0)),      # resident
            pl.BlockSpec((1, N_HALF), lambda i: (0, 0)),          # resident
            pl.BlockSpec((N_HALF, N_OUT_PAD), lambda i: (0, 0)),  # resident
            pl.BlockSpec((N_HALF, N_OUT_PAD), lambda i: (0, 0)),  # resident
            pl.BlockSpec((1, N_OUT_PAD), lambda i: (0, 0)),       # resident
        ],
        out_specs=pl.BlockSpec((tb, N_OUT_PAD), lambda i: (i, 0)),
        compiler_params=pltpu.CompilerParams(
            dimension_semantics=("parallel",),       # megacore shard on v7x
            vmem_limit_bytes=48 * 1024 * 1024,       # 2048-row tiles, v7x-safe
        ),
        cost_estimate=pl.CostEstimate(
            flops=flops, transcendentals=0, bytes_accessed=bytes_accessed),
    )(txt, img, head_w["wt"], head_w["bt"], head_w["wi"], head_w["bi"],
      head_w["w2t"], head_w["w2i"], head_w["b2"])
    return out[:B, :N_OUT]


# ----------------------------------------------------------------------------
# Deterministic parameter init (shapes from the module's __init__)
# ----------------------------------------------------------------------------
def init_params(key):
    ks = jax.random.split(key, 8)

    def unif(k, shape, fan_in):
        bound = 1.0 / jnp.sqrt(jnp.float32(fan_in))
        return jax.random.uniform(k, shape, jnp.float32, -bound, bound)

    return {
        # nn.Linear(768, 128): weight stored transposed [768, 128]
        "wt": unif(ks[0], (K_TXT, N_HALF), K_TXT),
        "bt": unif(ks[1], (1, N_HALF), K_TXT),
        # nn.Linear(1000, 128)
        "wi": unif(ks[2], (K_IMG, N_HALF), K_IMG),
        "bi": unif(ks[3], (1, N_HALF), K_IMG),
        # nn.Linear(256, 3): weight stored transposed [256, 3]
        "wf": unif(ks[4], (N_HID, N_OUT), N_HID),
        "bf": unif(ks[5], (1, N_OUT), N_HID),
        # stand-in backbone params
        "txt_emb": jax.random.normal(ks[6], (1000, K_TXT), jnp.float32) * 0.02,
        "img_proj": jax.random.normal(ks[7], (3, K_IMG), jnp.float32) * 0.02,
    }


# ----------------------------------------------------------------------------
# Stand-in backbones (plain JAX glue)
# ----------------------------------------------------------------------------
def txt_backbone(params, input_ids, attention_mask):
    # TODO(synk): pretrained XLNet-base (12-layer transformer) is not translated;
    # stand-in = mask-weighted mean of a deterministic token embedding table.
    emb = params["txt_emb"][input_ids]                      # [B, S, 768]
    mask = attention_mask.astype(jnp.float32)[..., None]    # [B, S, 1]
    return (emb * mask).sum(axis=1) / jnp.maximum(mask.sum(axis=1), 1.0)


def img_backbone(params, image):
    # TODO(synk): pretrained resnet152 is not translated; stand-in = global
    # average pool (NCHW) + deterministic linear to the [B, 1000] logit feature.
    pooled = image.mean(axis=(2, 3))                        # [B, 3]
    return pooled @ params["img_proj"]                      # [B, 1000]


def xlnet_res_early_forward(params, head_w, input_ids, attention_mask, image):
    txt_feat = txt_backbone(params, input_ids, attention_mask)   # [B, 768]
    img_feat = img_backbone(params, image)                       # [B, 1000]
    return fusion_head(txt_feat, img_feat, head_w)               # [B, 3]


# ----------------------------------------------------------------------------
# Pure-JAX reference of the head (same bf16-input / f32-accumulate path)
# ----------------------------------------------------------------------------
def head_reference(txt_feat, img_feat, params):
    t = jnp.maximum(
        jnp.dot(txt_feat.astype(jnp.bfloat16), params["wt"].astype(jnp.bfloat16),
                preferred_element_type=jnp.float32) + params["bt"], 0.0)
    i = jnp.maximum(
        jnp.dot(img_feat.astype(jnp.bfloat16), params["wi"].astype(jnp.bfloat16),
                preferred_element_type=jnp.float32) + params["bi"], 0.0)
    h = jnp.concatenate([t, i], axis=-1).astype(jnp.bfloat16)
    return jnp.dot(h, params["wf"].astype(jnp.bfloat16),
                   preferred_element_type=jnp.float32) + params["bf"]


# ----------------------------------------------------------------------------
if __name__ == "__main__":
    key = jax.random.PRNGKey(0)
    pkey, k1, k2 = jax.random.split(key, 3)

    params = init_params(pkey)
    head_w = prepare_head_weights(params)

    B, S = 2, 8
    input_ids = jax.random.randint(k1, (B, S), 0, 1000, dtype=jnp.int32)
    attention_mask = jnp.ones((B, S), dtype=jnp.int32)
    image = jax.random.normal(k2, (B, 3, 16, 16), dtype=jnp.float32)  # NCHW

    fwd = jax.jit(xlnet_res_early_forward)
    out = fwd(params, head_w, input_ids, attention_mask, image)
    out = jax.block_until_ready(out)

    # Cross-check the kernel against the pure-JAX reference.
    txt_feat = txt_backbone(params, input_ids, attention_mask)
    img_feat = img_backbone(params, image)
    ref = head_reference(txt_feat, img_feat, params)

    assert out.shape == (B, 3)
    assert jnp.allclose(out, ref, atol=2e-3, rtol=1e-2), (out, ref)

    print("KERNEL_OK")
</pallas_src>

<mosaic_0001>
module attributes {stable_mosaic.version = 11 : i64} {
  func.func @_fusion_head_kernel(%arg0: i32, %arg1: memref<8x768xbf16, #tpu.memory_space<vmem>>, %arg2: memref<8x1000xbf16, #tpu.memory_space<vmem>>, %arg3: memref<768x128xbf16, #tpu.memory_space<vmem>>, %arg4: memref<1x128xf32, #tpu.memory_space<vmem>>, %arg5: memref<1000x128xbf16, #tpu.memory_space<vmem>>, %arg6: memref<1x128xf32, #tpu.memory_space<vmem>>, %arg7: memref<128x128xbf16, #tpu.memory_space<vmem>>, %arg8: memref<128x128xbf16, #tpu.memory_space<vmem>>, %arg9: memref<1x128xf32, #tpu.memory_space<vmem>>, %arg10: memref<8x128xf32, #tpu.memory_space<vmem>>) attributes {dimension_semantics = [#tpu.dimension_semantics<parallel>], iteration_bounds = array<i64: 2>, scalar_prefetch = 0 : i64, scratch_operands = 0 : i64, tpu.core_type = #tpu.core_type<tc>, window_params = [{transform_indices = @transform_0, window_bounds = array<i64: 8, 768>}, {transform_indices = @transform_1, window_bounds = array<i64: 8, 1000>}, {pipeline_mode = #tpu.pipeline_mode<synchronous>, transform_indices = @transform_2, window_bounds = array<i64: 768, 128>}, {pipeline_mode = #tpu.pipeline_mode<synchronous>, transform_indices = @transform_3, window_bounds = array<i64: 1, 128>}, {pipeline_mode = #tpu.pipeline_mode<synchronous>, transform_indices = @transform_4, window_bounds = array<i64: 1000, 128>}, {pipeline_mode = #tpu.pipeline_mode<synchronous>, transform_indices = @transform_5, window_bounds = array<i64: 1, 128>}, {pipeline_mode = #tpu.pipeline_mode<synchronous>, transform_indices = @transform_6, window_bounds = array<i64: 128, 128>}, {pipeline_mode = #tpu.pipeline_mode<synchronous>, transform_indices = @transform_7, window_bounds = array<i64: 128, 128>}, {pipeline_mode = #tpu.pipeline_mode<synchronous>, transform_indices = @transform_8, window_bounds = array<i64: 1, 128>}, {transform_indices = @transform_9, window_bounds = array<i64: 8, 128>}]} {
    %c0 = arith.constant 0 : index
    %c0_0 = arith.constant 0 : index
    %0 = vector.load %arg1[%c0, %c0_0] : memref<8x768xbf16, #tpu.memory_space<vmem>>, vector<8x768xbf16>
    %c0_1 = arith.constant 0 : index
    %c0_2 = arith.constant 0 : index
    %1 = vector.load %arg3[%c0_1, %c0_2] : memref<768x128xbf16, #tpu.memory_space<vmem>>, vector<768x128xbf16>
    %cst = arith.constant dense<0.000000e+00> : vector<8x128xf32>
    %2 = tpu.matmul %0, %1, %cst {dimension_numbers = #tpu.dot_dimension_numbers<[1], [0], [0], [1], [0, 0, 1, 1], [], []>} : vector<8x768xbf16>, vector<768x128xbf16>, vector<8x128xf32> -> vector<8x128xf32>
    %c0_3 = arith.constant 0 : index
    %c0_4 = arith.constant 0 : index
    %3 = vector.load %arg4[%c0_3, %c0_4] : memref<1x128xf32, #tpu.memory_space<vmem>>, vector<1x128xf32>
    %4 = vector.broadcast %3 : vector<1x128xf32> to vector<8x128xf32>
    %5 = arith.addf %2, %4 : vector<8x128xf32>
    %cst_5 = arith.constant 0.000000e+00 : f32
    %6 = vector.broadcast %cst_5 : f32 to vector<8x128xf32>
    %7 = arith.maximumf %5, %6 : vector<8x128xf32>
    %c0_6 = arith.constant 0 : index
    %c0_7 = arith.constant 0 : index
    %8 = vector.load %arg2[%c0_6, %c0_7] : memref<8x1000xbf16, #tpu.memory_space<vmem>>, vector<8x1000xbf16>
    %c0_8 = arith.constant 0 : index
    %c0_9 = arith.constant 0 : index
    %9 = vector.load %arg5[%c0_8, %c0_9] : memref<1000x128xbf16, #tpu.memory_space<vmem>>, vector<1000x128xbf16>
    %cst_10 = arith.constant dense<0.000000e+00> : vector<8x128xf32>
    %10 = tpu.matmul %8, %9, %cst_10 {dimension_numbers = #tpu.dot_dimension_numbers<[1], [0], [0], [1], [0, 0, 1, 1], [], []>} : vector<8x1000xbf16>, vector<1000x128xbf16>, vector<8x128xf32> -> vector<8x128xf32>
    %c0_11 = arith.constant 0 : index
    %c0_12 = arith.constant 0 : index
    %11 = vector.load %arg6[%c0_11, %c0_12] : memref<1x128xf32, #tpu.memory_space<vmem>>, vector<1x128xf32>
    %12 = vector.broadcast %11 : vector<1x128xf32> to vector<8x128xf32>
    %13 = arith.addf %10, %12 : vector<8x128xf32>
    %cst_13 = arith.constant 0.000000e+00 : f32
    %14 = vector.broadcast %cst_13 : f32 to vector<8x128xf32>
    %15 = arith.maximumf %13, %14 : vector<8x128xf32>
    %16 = arith.truncf %7 : vector<8x128xf32> to vector<8x128xbf16>
    %c0_14 = arith.constant 0 : index
    %c0_15 = arith.constant 0 : index
    %17 = vector.load %arg7[%c0_14, %c0_15] : memref<128x128xbf16, #tpu.memory_space<vmem>>, vector<128x128xbf16>
    %cst_16 = arith.constant dense<0.000000e+00> : vector<8x128xf32>
    %18 = tpu.matmul %16, %17, %cst_16 {dimension_numbers = #tpu.dot_dimension_numbers<[1], [0], [0], [1], [0, 0, 1, 1], [], []>} : vector<8x128xbf16>, vector<128x128xbf16>, vector<8x128xf32> -> vector<8x128xf32>
    %19 = arith.truncf %15 : vector<8x128xf32> to vector<8x128xbf16>
    %c0_17 = arith.constant 0 : index
    %c0_18 = arith.constant 0 : index
    %20 = vector.load %arg8[%c0_17, %c0_18] : memref<128x128xbf16, #tpu.memory_space<vmem>>, vector<128x128xbf16>
    %cst_19 = arith.constant dense<0.000000e+00> : vector<8x128xf32>
    %21 = tpu.matmul %19, %20, %cst_19 {dimension_numbers = #tpu.dot_dimension_numbers<[1], [0], [0], [1], [0, 0, 1, 1], [], []>} : vector<8x128xbf16>, vector<128x128xbf16>, vector<8x128xf32> -> vector<8x128xf32>
    %22 = arith.addf %18, %21 : vector<8x128xf32>
    %c0_20 = arith.constant 0 : index
    %c0_21 = arith.constant 0 : index
    %23 = vector.load %arg9[%c0_20, %c0_21] : memref<1x128xf32, #tpu.memory_space<vmem>>, vector<1x128xf32>
    %24 = vector.broadcast %23 : vector<1x128xf32> to vector<8x128xf32>
    %25 = arith.addf %22, %24 : vector<8x128xf32>
    %c0_22 = arith.constant 0 : index
    %c0_23 = arith.constant 0 : index
    %26 = vector.load %arg10[%c0_22, %c0_23] : memref<8x128xf32, #tpu.memory_space<vmem>>, vector<8x128xf32>
    tpu.vector_store %arg10[%c0_22, %c0_23], %25 {strides = array<i32>} : memref<8x128xf32, #tpu.memory_space<vmem>>, vector<8x128xf32>,
    return
  }
  func.func @transform_0(%arg0: i32) -> (i32, i32) {
    %c0_i32 = arith.constant 0 : i32
    %c0_i32_0 = arith.constant 0 : i32
    return %arg0, %c0_i32 : i32, i32
  }
  func.func @transform_1(%arg0: i32) -> (i32, i32) {
    %c0_i32 = arith.constant 0 : i32
    %c0_i32_0 = arith.constant 0 : i32
    return %arg0, %c0_i32 : i32, i32
  }
  func.func @transform_2(%arg0: i32) -> (i32, i32) {
    %c0_i32 = arith.constant 0 : i32
    %c0_i32_0 = arith.constant 0 : i32
    %c0_i32_1 = arith.constant 0 : i32
    return %c0_i32, %c0_i32_0 : i32, i32
  }
  func.func @transform_3(%arg0: i32) -> (i32, i32) {
    %c0_i32 = arith.constant 0 : i32
    %c0_i32_0 = arith.constant 0 : i32
    %c0_i32_1 = arith.constant 0 : i32
    return %c0_i32, %c0_i32_0 : i32, i32
  }
  func.func @transform_4(%arg0: i32) -> (i32, i32) {
    %c0_i32 = arith.constant 0 : i32
    %c0_i32_0 = arith.constant 0 : i32
    %c0_i32_1 = arith.constant 0 : i32
    return %c0_i32, %c0_i32_0 : i32, i32
  }
  func.func @transform_5(%arg0: i32) -> (i32, i32) {
    %c0_i32 = arith.constant 0 : i32
    %c0_i32_0 = arith.constant 0 : i32
    %c0_i32_1 = arith.constant 0 : i32
    return %c0_i32, %c0_i32_0 : i32, i32
  }
  func.func @transform_6(%arg0: i32) -> (i32, i32) {
    %c0_i32 = arith.constant 0 : i32
    %c0_i32_0 = arith.constant 0 : i32
    %c0_i32_1 = arith.constant 0 : i32
    return %c0_i32, %c0_i32_0 : i32, i32
  }
  func.func @transform_7(%arg0: i32) -> (i32, i32) {
    %c0_i32 = arith.constant 0 : i32
    %c0_i32_0 = arith.constant 0 : i32
    %c0_i32_1 = arith.constant 0 : i32
    return %c0_i32, %c0_i32_0 : i32, i32
  }
  func.func @transform_8(%arg0: i32) -> (i32, i32) {
    %c0_i32 = arith.constant 0 : i32
    %c0_i32_0 = arith.constant 0 : i32
    %c0_i32_1 = arith.constant 0 : i32
    return %c0_i32, %c0_i32_0 : i32, i32
  }
  func.func @transform_9(%arg0: i32) -> (i32, i32) {
    %c0_i32 = arith.constant 0 : i32
    %c0_i32_0 = arith.constant 0 : i32
    return %arg0, %c0_i32 : i32, i32
  }
}

</mosaic_0001>

<bundles_post_ra>
// kernel: xlnet_res_early_forward.1
= control target key start
LH: loop header
LB: loop body
LE: loop exit
PB: predicated region body
PF: predicated region fallthrough
CT: control target
= control target key end

     0   :  { %14 = vsyncpa [#allocation3], 0  ;;  %s3075_s0 = inlined_call_operand.vmem [shape: bf16[16,768], index: 0, kind: input, shape index: {}]   ;;  %s3076_s1 = inlined_call_operand.vmem [shape: bf16[16,1000], index: 1, kind: input, shape index: {}]   ;;  %s3077_s2 = inlined_call_operand.hbm [shape: bf16[768,128], index: 2, kind: input, shape index: {}]   ;;  %s3078_s3 = inlined_call_operand.hbm [shape: f32[1,128], index: 3, kind: input, shape index: {}]   ;;  %s3079_s4 = inlined_call_operand.hbm [shape: bf16[1000,128], index: 4, kind: input, shape index: {}]   ;;  %s3080_s5 = inlined_call_operand.hbm [shape: f32[1,128], index: 5, kind: input, shape index: {}]   ;;  %s3081_s6 = inlined_call_operand.hbm [shape: bf16[128,128], index: 6, kind: input, shape index: {}]   ;;  %s3082_s7 = inlined_call_operand.hbm [shape: bf16[128,128], index: 7, kind: input, shape index: {}]   ;;  %s3083_s8 = inlined_call_operand.hbm [shape: f32[1,128], index: 8, kind: input, shape index: {}]   ;;  %s3084_s9 = inlined_call_operand.vmem [shape: f32[16,128], index: 9, kind: output, shape index: {}]  }
   0x1   :  { %15 = vsyncpa [#allocation5], 0 }
   0x2   :  { %16 = vsyncpa [#allocation8], 0 }
   0x3   :  { %17 = vsyncpa [#allocation11], 0  ;;  %s2899_s30 = smov 0  }
   0x4 LB: > { %s2837_s10 = smov [#allocation4]   ;;  %s2905_s12 = sadd.s32 4294967295, %s2835_s30   ;;  %s2835_s30 = sphi %s2899_s30, %s23_s30  }
   0x5   : > { %s279_s11 = sshll.u32 %s2837_s10, 4  ;;  %p2046_p0 = scmp.ge.s32.totalorder %s2835_s30, 1  ;;  %s280_s11 = int_to_ptr.vmem [resolvable:$true] %s279_s11 }
   0x6   : > { %p253_p1 = scmp.lt.s32.totalorder %s2835_s30, 3  ;;  %p2456_p2 = scmp.eq.s32.totalorder %s2905_s12, 0 }
   0x7   : > { %s2838_s14 = smov [#allocation7]   ;;  %s2839_s17 = smov [#allocation10]  }
   0x8   : > { %p2910_p3 = pnand %p2046_p0, %p253_p1  ;;  %s303_s15 = sshll.u32 %s2838_s14, 4  ;;  %s2916_s15 = int_to_ptr.vmem [resolvable:$true] %s303_s15 }
   0x9   : > { %s326_s18 = sshll.u32 %s2839_s17, 4  ;;  %s2840_s19 = smov [#allocation2]   ;;  %s2924_s18 = int_to_ptr.vmem [resolvable:$true] %s326_s18 }
   0xa   : > { %p2434_p4 = pneg %p2910_p3  ;;  %s2926_s20 = sshll.u32 %s2840_s19, 4  ;;  %s266_s20 = int_to_ptr.vmem [resolvable:$true] %s2926_s20 }
   0xb   : > { %s2642_s22 = scalar_lea.vmem %s280_s11, 16  ;;  %s2649_s23 = scalar_lea.vmem %s280_s11, 32 }
   0xc   : > { %p2920_p5 = pnand %p2456_p2, %p2434_p4  ;;  %p2643_p7 = scmp.ne.s32.totalorder %s280_s11, %s2642_s22 }
   0xd   : > { %p2650_p10 = scmp.lt.s32.totalorder %s280_s11, %s280_s11  ;;  %p2651_p11 = scmp.lt.s32.totalorder %s2649_s23, %s2642_s22 }
   0xe   : > { %p2930_p6 = pneg %p2920_p5 }
   0xf   : > { %p2652_p12 = por %p2651_p11, %p2650_p10 }
  0x10   : > { %p2645_p8 = pnand %p2643_p7, %p2930_p6 }
  0x12   : > { %p2646_p9 = pneg %p2645_p8 }
  0x14   : > { %p2653_p13 = pnand %p2652_p12, %p2646_p9 }
  0x16   : > { %2656 = shalt.err (!%p2653_p13)
}
  0x17   : > { %2440 = dma.hbm_to_vmem [thread:$0]  (!%p2920_p5), %s3078_s3, 16, %s280_s11, [#allocation5]  }
  0x18   : > { %s2668_s26 = scalar_lea.vmem %s2916_s15, 16  ;;  %s2675_s27 = scalar_lea.vmem %s2916_s15, 32 }
  0x19   : > { %p2669_p0 = scmp.ne.s32.totalorder %s2916_s15, %s2668_s26  ;;  %p2676_p7 = scmp.lt.s32.totalorder %s2916_s15, %s2916_s15 }
  0x1a   : > { %p2677_p8 = scmp.lt.s32.totalorder %s2675_s27, %s2668_s26 }
  0x1b   : > { %p2671_p1 = pnand %p2669_p0, %p2930_p6 }
  0x1c   : > { %p2678_p9 = por %p2677_p8, %p2676_p7 }
  0x1d   : > { %p2672_p4 = pneg %p2671_p1 }
  0x1f   : > { %p2679_p10 = pnand %p2678_p9, %p2672_p4 }
  0x21   : > { %2682 = shalt.err (!%p2679_p10)
}
  0x22   : > { %2446 = dma.hbm_to_vmem [thread:$0]  (!%p2920_p5), %s3080_s5, 16, %s2916_s15, [#allocation8]  }
  0x23   : > { %s2694_s10 = scalar_lea.vmem %s2924_s18, 1024  ;;  %p2702_p0 = scmp.lt.s32.totalorder %s2924_s18, %s2924_s18 }
  0x24   : > { %p2695_p11 = scmp.ne.s32.totalorder %s2924_s18, %s2694_s10  ;;  %p2703_p1 = scmp.lt.s32.totalorder %s2694_s10, %s2694_s10 }
  0x26   : > { %p2697_p12 = pnand %p2695_p11, %p2930_p6  ;;  %p2704_p4 = por %p2703_p1, %p2702_p0 }
  0x28   : > { %p2698_p13 = pneg %p2697_p12 }
  0x2a   : > { %p2705_p7 = pnand %p2704_p4, %p2698_p13 }
  0x2c   : > { %2708 = shalt.err (!%p2705_p7)
}
  0x2d   : > { %s2841_s11 = smov 64   ;;  %s2842_s14 = smov 4  }
  0x2e   : > { %2452 = dma.hbm_to_vmem [thread:$0]  (!%p2920_p5), %s3082_s7, 1024, %s2924_s18, [#allocation11], %s2841_s11, %s2841_s11, %s2842_s14  }
  0x2f   : > { %s2720_s19 = scalar_lea.vmem %s266_s20, 6144  ;;  %p2728_p11 = scmp.lt.s32.totalorder %s266_s20, %s266_s20 }
  0x30   : > { %p2721_p8 = scmp.ne.s32.totalorder %s266_s20, %s2720_s19  ;;  %p2729_p12 = scmp.lt.s32.totalorder %s2720_s19, %s2720_s19 }
  0x32   : > { %p2723_p9 = pnand %p2721_p8, %p2930_p6  ;;  %p2730_p13 = por %p2729_p12, %p2728_p11 }
  0x34   : > { %p2724_p10 = pneg %p2723_p9 }
  0x36   : > { %p2731_p0 = pnand %p2730_p13, %p2724_p10 }
  0x38   : > { %2734 = shalt.err (!%p2731_p0)
}
  0x39   : > { %2437 = dma.hbm_to_vmem [thread:$0]  (!%p2920_p5), %s3077_s2, 6144, %s266_s20, [#allocation3], %s2841_s11, %s2841_s11, %s2842_s14  }
  0x3a   : > { %s2843_s18 = smov [#allocation6]   ;;  %s2844_s25 = smov [#allocation9]  }
  0x3b   : > { %s289_s24 = sshll.u32 %s2843_s18, 4  ;;  %s313_s26 = sshll.u32 %s2844_s25, 4  ;;  %s290_s24 = int_to_ptr.vmem [resolvable:$true] %s289_s24  ;;  %s314_s26 = int_to_ptr.vmem [resolvable:$true] %s313_s26 }
  0x3c   : > { %s2746_s27 = scalar_lea.vmem %s290_s24, 8000  ;;  %p2754_p8 = scmp.lt.s32.totalorder %s290_s24, %s290_s24 }
  0x3d   : > { %p2747_p1 = scmp.ne.s32.totalorder %s290_s24, %s2746_s27  ;;  %p2755_p9 = scmp.lt.s32.totalorder %s2746_s27, %s2746_s27 }
  0x3f   : > { %p2749_p4 = pnand %p2747_p1, %p2930_p6  ;;  %p2756_p10 = por %p2755_p9, %p2754_p8 }
  0x41   : > { %p2750_p7 = pneg %p2749_p4 }
  0x43   : > { %p2757_p11 = pnand %p2756_p10, %p2750_p7 }
  0x45   : > { %2760 = shalt.err (!%p2757_p11)
}
  0x46   : > { %2443 = dma.hbm_to_vmem [thread:$0]  (!%p2920_p5), %s3079_s4, 8000, %s290_s24, [#allocation5], %s2841_s11, %s2841_s11, %s2842_s14  }
  0x47   : > { %s2772_s29 = scalar_lea.vmem %s314_s26, 1024  ;;  %p2780_p1 = scmp.lt.s32.totalorder %s314_s26, %s314_s26 }
  0x48   : > { %p2773_p12 = scmp.ne.s32.totalorder %s314_s26, %s2772_s29  ;;  %p2781_p4 = scmp.lt.s32.totalorder %s2772_s29, %s2772_s29 }
  0x4a   : > { %p2775_p13 = pnand %p2773_p12, %p2930_p6  ;;  %p2782_p7 = por %p2781_p4, %p2780_p1 }
  0x4c   : > { %p2776_p0 = pneg %p2775_p13 }
  0x4e   : > { %p2783_p8 = pnand %p2782_p7, %p2776_p0 }
  0x50   : > { %2786 = shalt.err (!%p2783_p8)
}
  0x51   : > { %2449 = dma.hbm_to_vmem [thread:$0]  (!%p2920_p5), %s3081_s6, 1024, %s314_s26, [#allocation8], %s2841_s11, %s2841_s11, %s2842_s14  }
  0x52   : > { %s2845_s17 = smov [#allocation12]  }
  0x53   : > { %s340_s19 = sshll.u32 %s2845_s17, 4  ;;  %s341_s19 = int_to_ptr.vmem [resolvable:$true] %s340_s19 }
  0x54   : > { %s2798_s22 = scalar_lea.vmem %s341_s19, 16  ;;  %s2805_s23 = scalar_lea.vmem %s341_s19, 32 }
  0x55   : > { %p2799_p9 = scmp.ne.s32.totalorder %s341_s19, %s2798_s22  ;;  %p2806_p12 = scmp.lt.s32.totalorder %s341_s19, %s341_s19 }
  0x56   : > { %p2807_p13 = scmp.lt.s32.totalorder %s2805_s23, %s2798_s22 }
  0x57   : > { %p2801_p10 = pnand %p2799_p9, %p2930_p6 }
  0x58   : > { %p2808_p0 = por %p2807_p13, %p2806_p12 }
  0x59   : > { %p2802_p11 = pneg %p2801_p10 }
  0x5b   : > { %p2809_p1 = pnand %p2808_p0, %p2802_p11 }
  0x5d   : > { %2812 = shalt.err (!%p2809_p1)
}
  0x5e   : > { %2455 = dma.hbm_to_vmem [thread:$0]  (!%p2920_p5), %s3083_s8, 16, %s341_s19, [#allocation11]  }
  0x5f   : > { %369 = sbr.rel (%p2910_p3) target bundleno = 694 (0x2b6), region = 56 }
  0x64   : > { %2818 = dma.done.wait (%p2456_p2), [#allocation3], 6144  }
  0x65   : > { %2820 = vsyncadd (%p2456_p2), [#allocation3], 4294961152 }
  0x66   : > { %2822 = dma.done.wait (%p2456_p2), [#allocation5], 8016  }
  0x67   : > { %2824 = vsyncadd (%p2456_p2), [#allocation5], 4294959280 }
  0x68   : > { %2826 = dma.done.wait (%p2456_p2), [#allocation8], 1040  }
  0x69   : > { %2828 = vsyncadd (%p2456_p2), [#allocation8], 4294966256 }
  0x6a   : > { %2830 = dma.done.wait (%p2456_p2), [#allocation11], 1040  }
  0x6b   : > { %2832 = vsyncadd (%p2456_p2), [#allocation11], 4294966256  ;;  %v2490_v0 = vld [vmem:[#allocation2 + $0x78] sm:$0xff]   ;;  %v2494_v4 = vld [vmem:[#allocation2 + $0x70] sm:$0xff]   ;;  %p433_p2 = scmp.lt.s32.totalorder %s2905_s12, 1  ;;  %vm1522_vm0 = vcmask 850944  }
  0x6c   : > { %v2491_v1 = vld [vmem:[#allocation2 + $0x38] sm:$0xff]   ;;  %2215 = vmatprep.subr.bf16.mxu0 %v2490_v0  ;;  %v2495_v5 = vld [vmem:[#allocation2 + $0x30] sm:$0xff]   ;;  %v2498_v8 = vld [vmem:[#allocation2 + $0x68] sm:$0xff]   ;;  %vm1526_vm1 = vcmask 1043456   ;;  %vm2848_vm2 = vmmov 0  }
  0x6d   : > { %v2492_v2 = vld [vmem:[#allocation2 + $0xf8] sm:$0xff]   ;;  %2216 = vmatpush3.bf16.msra.mxu0 %v2491_v1  ;;  %v2496_v6 = vld [vmem:[#allocation2 + $0xf0] sm:$0xff]   ;;  %v2499_v9 = vld [vmem:[#allocation2 + $0x28] sm:$0xff]   ;;  %s3089_s12 = smov (!%p433_p2, %s2905_s12), 1 }
  0x6e   : > { %v2493_v3 = vld [vmem:[#allocation2 + $0xb8] sm:$0xff]   ;;  %2237 = vmatprep.subr.bf16.mxu1 %v2492_v2  ;;  %2217 = vmatprep.subr.bf16.mxu0 %v2494_v4  ;;  %v2497_v7 = vld [vmem:[#allocation2 + $0xb0] sm:$0xff]   ;;  %v2500_v10 = vld [vmem:[#allocation2 + $0xe8] sm:$0xff]   ;;  %s2405_s13 = smul.u32 24, %s3089_s12  ;;  %s2214_s14 = sshll.u32 %s3089_s12, 5 }
  0x6f   : > { %2238 = vmatpush3.bf16.msra.mxu1 %v2493_v3  ;;  %v2501_v11 = vld [vmem:[#allocation2 + $0xa8] sm:$0xff]   ;;  %v2502_v12 = vld [vmem:[#allocation2 + $0x60] sm:$0xff]   ;;  %v2506_v16 = vld [vmem:[#allocation2 + $0x58] sm:$0xff]   ;;  %s3042_s27 = scalar_lea.vmem %s3076_s1, %s2214_s14  ;;  %s2066_s20 = sshll.u32 %s3089_s12, 3 }
  0x70   : > { %2239 = vmatprep.subr.bf16.mxu1 %v2496_v6  ;;  %v2503_v13 = vld [vmem:[#allocation2 + $0x20] sm:$0xff]   ;;  %v2507_v17 = vld [vmem:[#allocation2 + $0x18] sm:$0xff]   ;;  %v2510_v20 = vld [vmem:[#allocation2 + $0x50] sm:$0xff]   ;;  %s3033_s11 = scalar_lea.vmem %s3075_s0, %s2405_s13  ;;  %s446_s10 = scalar_lea.vmem %s3084_s9, %s2066_s20 }
  0x71   : > { %2218 = vmatpush3.bf16.msra.mxu0 %v2495_v5  ;;  %v2504_v14 = vld [vmem:[#allocation2 + $0xe0] sm:$0xff]   ;;  %v2508_v18 = vld [vmem:[#allocation2 + $0xd8] sm:$0xff]   ;;  %v2511_v21 = vld [vmem:[#allocation2 + $0x10] sm:$0xff]  }
  0x72   : > { %2219 = vmatprep.subr.bf16.mxu0 %v2498_v8  ;;  %v2505_v15 = vld [vmem:[#allocation2 + $0xa0] sm:$0xff]   ;;  %v2509_v19 = vld [vmem:[#allocation2 + $0x98] sm:$0xff]   ;;  %v2512_v22 = vld [vmem:[#allocation2 + $0xd0] sm:$0xff]  }
  0x73   : > { %2240 = vmatpush3.bf16.msra.mxu1 %v2497_v7  ;;  %v2513_v23 = vld [vmem:[#allocation2 + $0x90] sm:$0xff]   ;;  %v2514_v24 = vld [vmem:[#allocation2 + $0x48] sm:$0xff]   ;;  %v2518_v28 = vld [vmem:[#allocation2 + $0x40] sm:$0xff]  }
  0x74   : > { %2241 = vmatprep.subr.bf16.mxu1 %v2500_v10  ;;  %v2515_v25 = vld [vmem:[#allocation2 + $0x8] sm:$0xff]   ;;  %v2519_v29 = vld [vmem:[#allocation2] sm:$0xff]   ;;  %v2524_v35 = vld [vmem:[#allocation2 + $0x178] sm:$0xff]  }
  0x75   : > { %2220 = vmatpush3.bf16.msra.mxu0 %v2499_v9  ;;  %v2516_v26 = vld [vmem:[#allocation2 + $0xc8] sm:$0xff]   ;;  %v2520_v30 = vld [vmem:[#allocation2 + $0xc0] sm:$0xff]   ;;  %v2527_v39 = vld [vmem:[#allocation2 + $0x138] sm:$0xff]  }
  0x76   : > { %2221 = vmatprep.subr.bf16.mxu0 %v2502_v12  ;;  %v2517_v27 = vld [vmem:[#allocation2 + $0x88] sm:$0xff]   ;;  %v448_v31 = vld [vmem:[%s3033_s11] sm:$0xff]  ;;  %v2530_v42 = vld [vmem:[#allocation2 + $0x170] sm:$0xff]  }
  0x77   : > { %2242 = vmatpush3.bf16.msra.mxu1 %v2501_v11  ;;  %v2068_v32 = vcombine.low %v448_v31, %v448_v31  ;;  %v2069_v33 = vcombine.high %v448_v31, %v448_v31  ;;  %v2523_v34 = vld [vmem:[#allocation2 + $0x80] sm:$0xff]   ;;  %v449_v36 = vld [vmem:[%s3033_s11 + $0x8] sm:$0xff]  ;;  %v2531_v43 = vld [vmem:[#allocation2 + $0x130] sm:$0xff]  }
  0x78   : > { %2243 = vmatprep.subr.bf16.mxu1 %v2504_v14  ;;  %v2070_v37 = vcombine.low %v449_v36, %v449_v36  ;;  %v2071_v38 = vcombine.high %v449_v36, %v449_v36  ;;  %v2528_v40 = vld [vmem:[#allocation6 + $0x78] sm:$0xff]   ;;  %v2532_v44 = vld [vmem:[#allocation6 + $0x70] sm:$0xff]   ;;  %v2534_v46 = vld [vmem:[#allocation2 + $0x168] sm:$0xff]  }
  0x79   : > { %2222 = vmatpush3.bf16.msra.mxu0 %v2503_v13  ;;  %895 = vmatprep.mubr.bf16.mxu0 %v2069_v33  ;;  %v2529_v41 = vld [vmem:[#allocation6 + $0x38] sm:$0xff]   ;;  %v2533_v45 = vld [vmem:[#allocation6 + $0x30] sm:$0xff]   ;;  %v2535_v47 = vld [vmem:[#allocation2 + $0x128] sm:$0xff]  }
  0x7a   : > { %2223 = vmatprep.subr.bf16.mxu0 %v2506_v16  ;;  %935 = vmatprep.mubr.bf16.mxu1 %v2071_v38  ;;  %v2536_v48 = vld [vmem:[#allocation6 + $0x68] sm:$0xff]   ;;  %v2538_v50 = vld [vmem:[#allocation2 + $0x160] sm:$0xff]   ;;  %v2542_v54 = vld [vmem:[#allocation2 + $0x158] sm:$0xff]  }
  0x7b   : > { %2244 = vmatpush3.bf16.msra.mxu1 %v2505_v15  ;;  %v2537_v49 = vld [vmem:[#allocation6 + $0x28] sm:$0xff]   ;;  %v2539_v51 = vld [vmem:[#allocation2 + $0x120] sm:$0xff]   ;;  %v2543_v55 = vld [vmem:[#allocation2 + $0x118] sm:$0xff]  }
  0x7c   : > { %2245 = vmatprep.subr.bf16.mxu1 %v2508_v18  ;;  %v2540_v52 = vld [vmem:[#allocation6 + $0x60] sm:$0xff]   ;;  %v2544_v56 = vld [vmem:[#allocation6 + $0x58] sm:$0xff]   ;;  %v2546_v58 = vld [vmem:[#allocation2 + $0x150] sm:$0xff]  }
  0x7d   : > { %2224 = vmatpush3.bf16.msra.mxu0 %v2507_v17  ;;  %v2541_v53 = vld [vmem:[#allocation6 + $0x20] sm:$0xff]   ;;  %v2545_v57 = vld [vmem:[#allocation6 + $0x18] sm:$0xff]   ;;  %v2547_v59 = vld [vmem:[#allocation2 + $0x110] sm:$0xff]  }
  0x7e   : > { %2225 = vmatprep.subr.bf16.mxu0 %v2510_v20  ;;  %v2548_v60 = vld [vmem:[#allocation6 + $0x50] sm:$0xff]   ;;  %v2550_v62 = vld [vmem:[#allocation2 + $0x148] sm:$0xff]   ;;  %v2554_v2 = vld [vmem:[#allocation2 + $0x140] sm:$0xff]  }
  0x7f   : > { %2246 = vmatpush3.bf16.msra.mxu1 %v2509_v19  ;;  %v2549_v61 = vld [vmem:[#allocation6 + $0x10] sm:$0xff]   ;;  %v2551_v63 = vld [vmem:[#allocation2 + $0x108] sm:$0xff]   ;;  %v2555_v3 = vld [vmem:[#allocation2 + $0x100] sm:$0xff]  }
  0x80   : > { %2247 = vmatprep.subr.bf16.mxu1 %v2512_v22  ;;  %v2552_v0 = vld [vmem:[#allocation6 + $0x48] sm:$0xff]   ;;  %v2556_v4 = vld [vmem:[#allocation6 + $0x40] sm:$0xff]   ;;  %v2560_v9 = vld [vmem:[#allocation6 + $0xf8] sm:$0xff]  }
  0x81   : > { %2226 = vmatpush3.bf16.msra.mxu0 %v2511_v21  ;;  %v2553_v1 = vld [vmem:[#allocation6 + $0x8] sm:$0xff]   ;;  %v2559_v8 = vld [vmem:[#allocation6] sm:$0xff]   ;;  %v2561_v10 = vld [vmem:[#allocation6 + $0xb8] sm:$0xff]  }
  0x82   : > { %2227 = vmatprep.subr.bf16.mxu0 %v2514_v24  ;;  %v450_v5 = vld [vmem:[%s3033_s11 + $0x10] sm:$0xff]  ;;  %v984_v11 = vld [vmem:[%s3042_s27] sm:$0xff] }
  0x83   : > { %2248 = vmatpush3.bf16.msra.mxu1 %v2513_v23  ;;  %v2072_v6 = vcombine.low %v450_v5, %v450_v5  ;;  %v2073_v7 = vcombine.high %v450_v5, %v450_v5  ;;  %v2123_v12 = vcombine.low %v984_v11, %v984_v11  ;;  %v2124_v13 = vcombine.high %v984_v11, %v984_v11  ;;  %v2564_v14 = vld [vmem:[#allocation6 + $0x178] sm:$0xff]   ;;  %v2566_v16 = vld [vmem:[#allocation6 + $0xf0] sm:$0xff]   ;;  %v2570_v20 = vld [vmem:[#allocation6 + $0xe8] sm:$0xff]  }
  0x84   : > { %2249 = vmatprep.subr.bf16.mxu1 %v2516_v26  ;;  %v2565_v15 = vld [vmem:[#allocation6 + $0x138] sm:$0xff]   ;;  %v2567_v17 = vld [vmem:[#allocation6 + $0xb0] sm:$0xff]   ;;  %v2571_v21 = vld [vmem:[#allocation6 + $0xa8] sm:$0xff]  }
  0x85   : > { %2228 = vmatpush3.bf16.msra.mxu0 %v2515_v25  ;;  %v2568_v18 = vld [vmem:[#allocation6 + $0x170] sm:$0xff]   ;;  %v2572_v22 = vld [vmem:[#allocation6 + $0x168] sm:$0xff]   ;;  %v2574_v24 = vld [vmem:[#allocation6 + $0xe0] sm:$0xff]  }
  0x86   : > { %2229 = vmatprep.subr.bf16.mxu0 %v2518_v28  ;;  %v2569_v19 = vld [vmem:[#allocation6 + $0x130] sm:$0xff]   ;;  %v2573_v23 = vld [vmem:[#allocation6 + $0x128] sm:$0xff]   ;;  %v2575_v25 = vld [vmem:[#allocation6 + $0xa0] sm:$0xff]  }
  0x87   : > { %2250 = vmatpush3.bf16.msra.mxu1 %v2517_v27  ;;  %v2576_v26 = vld [vmem:[#allocation6 + $0x160] sm:$0xff]   ;;  %v2578_v28 = vld [vmem:[#allocation6 + $0xd8] sm:$0xff]   ;;  %v2583_v33 = vld [vmem:[#allocation6 + $0x90] sm:$0xff]  }
  0x88   : > { %2251 = vmatprep.subr.bf16.mxu1 %v2520_v30  ;;  %v2577_v27 = vld [vmem:[#allocation6 + $0x120] sm:$0xff]   ;;  %v2580_v30 = vld [vmem:[#allocation6 + $0x158] sm:$0xff]   ;;  %v2586_v36 = vld [vmem:[#allocation6 + $0xc8] sm:$0xff]  }
  0x89   : > { %2230 = vmatpush3.bf16.msra.mxu0 %v2519_v29  ;;  %v2579_v29 = vld [vmem:[#allocation6 + $0x98] sm:$0xff]   ;;  %v2588_v38 = vld [vmem:[#allocation6 + $0x148] sm:$0xff]  }
  0x8a   : > { %2259 = vmatprep.subr.bf16.mxu0 %v2524_v35  ;;  %v2581_v31 = vld [vmem:[#allocation6 + $0x118] sm:$0xff]   ;;  %v2585_v35 = vld [vmem:[#allocation6 + $0x110] sm:$0xff]  }
  0x8b   : > { %2252 = vmatpush3.bf16.msra.mxu1 %v2523_v34  ;;  %v2584_v34 = vld [vmem:[#allocation6 + $0x150] sm:$0xff]  }
  0x8c   : > { %896 = vmatmul.mubr.bf16.vlgmr.msra.gmra.mxu0 %v2068_v32  ;;  %2281 = vmatprep.subr.bf16.mxu1 %v2528_v40  ;;  %v2582_v32 = vld [vmem:[#allocation6 + $0xd0] sm:$0xff]   ;;  %v2590_v40 = vld [vmem:[#allocation6 + $0xc0] sm:$0xff]  }
  0x8d   : > { %2260 = vmatpush3.bf16.msra.mxu0 %v2527_v39  ;;  %975 = vmatprep.mubr.bf16.mxu0 %v2073_v7  ;;  %v2589_v39 = vld [vmem:[#allocation6 + $0x108] sm:$0xff]   ;;  %v2847_v7 = vmov 0.0  }
  0x8e   : > { %936 = vmatmul.mubr.bf16.vlgmr.msra.gmra.mxu1 %v2070_v37  ;;  %2261 = vmatprep.subr.bf16.mxu0 %v2530_v42  ;;  %v2587_v37 = vld [vmem:[#allocation6 + $0x88] sm:$0xff]   ;;  %v2592_v42 = vld [vmem:[#allocation6 + $0x140] sm:$0xff]  }
  0x8f   : > { %2282 = vmatpush3.bf16.msra.mxu1 %v2529_v41  ;;  %1562 = vmatprep.mubr.bf16.mxu1 %v2124_v13  ;;  %v2591_v41 = vld [vmem:[#allocation6 + $0x80] sm:$0xff]   ;;  %v2619_v11 = vld [vmem:[#allocation10 + $0x18] sm:$0xff]  }
  0x90   : > { %2283 = vmatprep.subr.bf16.mxu1 %v2532_v44  ;;  %v2621_v13 = vld [vmem:[#allocation10 + $0x8] sm:$0xff]  }
  0x91   : > { %2262 = vmatpush3.bf16.msra.mxu0 %v2531_v43  ;;  %v985_v43 = vld [vmem:[%s3042_s27 + $0x8] sm:$0xff] }
  0x92   : > { %2263 = vmatprep.subr.bf16.mxu0 %v2534_v46  ;;  %v2125_v44 = vcombine.low %v985_v43, %v985_v43  ;;  %v2595_v46 = vld [vmem:[#allocation6 + $0x100] sm:$0xff]  }
  0x93   : > { %2284 = vmatpush3.bf16.msra.mxu1 %v2533_v45  ;;  %v2126_v45 = vcombine.high %v985_v43, %v985_v43 }
  0x94   : > { %2285 = vmatprep.subr.bf16.mxu1 %v2536_v48  ;;  %v2846_v48 = vmov 0  }
  0x95   : > { %2264 = vmatpush3.bf16.msra.mxu0 %v2535_v47  ;;  %v986_v47 = vld [vmem:[%s3042_s27 + $0x10] sm:$0xff] }
  0x96   : > { %2265 = vmatprep.subr.bf16.mxu0 %v2538_v50  ;;  %v2598_v50 = vld [vmem:[#allocation6 + $0x1b8] sm:$0xff]  }
  0x97   : > { %2286 = vmatpush3.bf16.msra.mxu1 %v2537_v49  ;;  %v2128_v49 = vcombine.high %v986_v47, %v986_v47 }
  0x98   : > { %2287 = vmatprep.subr.bf16.mxu1 %v2540_v52  ;;  %v2599_v52 = vld [vmem:[#allocation6 + $0x1b0] sm:$0xff]  }
  0x99   : > { %2266 = vmatpush3.bf16.msra.mxu0 %v2539_v51  ;;  %v2127_v51 = vcombine.low %v986_v47, %v986_v47  ;;  %v2122_v47 = vld [vmem:[#allocation7] ss:$0 sm:$0xff] }
  0x9a   : > { %2267 = vmatprep.subr.bf16.mxu0 %v2542_v54  ;;  %v2601_v54 = vld [vmem:[#allocation6 + $0x1a0] sm:$0xff]  }
  0x9b   : > { %2288 = vmatpush3.bf16.msra.mxu1 %v2541_v53  ;;  %v2600_v53 = vld [vmem:[#allocation6 + $0x1a8] sm:$0xff]  }
  0x9c   : > { %2289 = vmatprep.subr.bf16.mxu1 %v2544_v56  ;;  %v2602_v56 = vld [vmem:[#allocation6 + $0x198] sm:$0xff]  }
  0x9d   : > { %2268 = vmatpush3.bf16.msra.mxu0 %v2543_v55  ;;  %v987_v55 = vld [vmem:[%s3042_s27 + $0x18] sm:$0xff] }
  0x9e   : > { %2269 = vmatprep.subr.bf16.mxu0 %v2546_v58  ;;  %v2603_v58 = vld [vmem:[#allocation6 + $0x190] sm:$0xff]   ;;  %v2129_v5 = vcombine.low %v987_v55, %v987_v55 }
  0x9f   : > { %2290 = vmatpush3.bf16.msra.mxu1 %v2545_v57  ;;  %v2130_v57 = vcombine.high %v987_v55, %v987_v55 }
  0xa0   : > { %2291 = vmatprep.subr.bf16.mxu1 %v2548_v60  ;;  %v2605_v60 = vld [vmem:[#allocation6 + $0x180] sm:$0xff]  }
  0xa1   : > { %2270 = vmatpush3.bf16.msra.mxu0 %v2547_v59  ;;  %v2604_v59 = vld [vmem:[#allocation6 + $0x188] sm:$0xff]  }
  0xa2   : > { %2271 = vmatprep.subr.bf16.mxu0 %v2550_v62 }
  0xa3   : > { %2292 = vmatpush3.bf16.msra.mxu1 %v2549_v61  ;;  %v2606_v61 = vld [vmem:[#allocation6 + $0x1f0] ss:$0 sps:$4 sm:$0xff]  }
  0xa4   : > { %2293 = vmatprep.subr.bf16.mxu1 %v2552_v0  ;;  %v1528_v62 = vsel %vm1526_vm1, %v2606_v61, 0  ;;  %v2608_v0 = vld [vmem:[#allocation6 + $0x1e0] sm:$0xff]  }
  0xa5   : > { %2272 = vmatpush3.bf16.msra.mxu0 %v2551_v63  ;;  %v2607_v63 = vld [vmem:[#allocation6 + $0x1e8] sm:$0xff]  }
  0xa6   : > { %2273 = vmatprep.subr.bf16.mxu0 %v2554_v2  ;;  %v2610_v2 = vld [vmem:[#allocation6 + $0x1d0] sm:$0xff]   ;;  %v2624_v61 = vld [vmem:[#allocation9 + $0x30] sm:$0xff]  }
  0xa7   : > { %2294 = vmatpush3.bf16.msra.mxu1 %v2553_v1  ;;  %v2609_v1 = vld [vmem:[#allocation6 + $0x1d8] sm:$0xff]  }
  0xa8   : > { %2295 = vmatprep.subr.bf16.mxu1 %v2556_v4  ;;  %v2612_v4 = vld [vmem:[#allocation6 + $0x1c0] sm:$0xff]  }
  0xa9   : > { %2274 = vmatpush3.bf16.msra.mxu0 %v2555_v3  ;;  %v2611_v3 = vld [vmem:[#allocation6 + $0x1c8] sm:$0xff]  }
  0xaa   : > { %2303 = vmatprep.subr.bf16.mxu0 %v2560_v9  ;;  %v2617_v9 = vld [vmem:[#allocation10 + $0x28] sm:$0xff]  }
  0xab   : > { %2296 = vmatpush3.bf16.msra.mxu1 %v2559_v8  ;;  %v2616_v8 = vld [vmem:[#allocation10 + $0x30] sm:$0xff]  }
  0xac   : > { %976 = vmatmul.mubr.bf16.vlgmr.msra.gmra.mxu0 %v2072_v6  ;;  %2325 = vmatprep.subr.bf16.mxu1 %v2564_v14  ;;  %v2615_v6 = vld [vmem:[#allocation10 + $0x38] sm:$0xff]   ;;  %v2622_v14 = vld [vmem:[#allocation10] sm:$0xff]  }
  0xad   : > { %2304 = vmatpush3.bf16.msra.mxu0 %v2561_v10  ;;  %1602 = vmatprep.mubr.bf16.mxu0 %v2126_v45  ;;  %v2618_v10 = vld [vmem:[#allocation10 + $0x20] sm:$0xff]  }
  0xae   : > { %1563 = vmatmul.mubr.bf16.vlgmr.msra.gmra.mxu1 %v2123_v12  ;;  %2305 = vmatprep.subr.bf16.mxu0 %v2566_v16  ;;  %v2620_v12 = vld [vmem:[#allocation10 + $0x10] sm:$0xff]   ;;  %v2067_v16 = vld [vmem:[#allocation4] ss:$0 sm:$0xff] }
  0xaf   : > { %2326 = vmatpush3.bf16.msra.mxu1 %v2565_v15  ;;  %1642 = vmatprep.mubr.bf16.mxu1 %v2128_v49 }
  0xb0   : > { %2327 = vmatprep.subr.bf16.mxu1 %v2568_v18 }
  0xb1   : > { %2306 = vmatpush3.bf16.msra.mxu0 %v2567_v17 }
  0xb2   : > { %2307 = vmatprep.subr.bf16.mxu0 %v2570_v20 }
  0xb3   : > { %2328 = vmatpush3.bf16.msra.mxu1 %v2569_v19 }
  0xb4   : > { %2329 = vmatprep.subr.bf16.mxu1 %v2572_v22 }
  0xb5   : > { %2308 = vmatpush3.bf16.msra.mxu0 %v2571_v21 }
  0xb6   : > { %2309 = vmatprep.subr.bf16.mxu0 %v2574_v24 }
  0xb7   : > { %2330 = vmatpush3.bf16.msra.mxu1 %v2573_v23 }
  0xb8   : > { %2331 = vmatprep.subr.bf16.mxu1 %v2576_v26 }
  0xb9   : > { %2310 = vmatpush3.bf16.msra.mxu0 %v2575_v25 }
  0xba   : > { %2311 = vmatprep.subr.bf16.mxu0 %v2578_v28 }
  0xbb   : > { %2332 = vmatpush3.bf16.msra.mxu1 %v2577_v27 }
  0xbc   : > { %2333 = vmatprep.subr.bf16.mxu1 %v2580_v30 }
  0xbd   : > { %2312 = vmatpush3.bf16.msra.mxu0 %v2579_v29 }
  0xbe   : > { %2313 = vmatprep.subr.bf16.mxu0 %v2582_v32 }
  0xbf   : > { %2334 = vmatpush3.bf16.msra.mxu1 %v2581_v31 }
  0xc0   : > { %2335 = vmatprep.subr.bf16.mxu1 %v2584_v34 }
  0xc1   : > { %2314 = vmatpush3.bf16.msra.mxu0 %v2583_v33 }
  0xc2   : > { %2315 = vmatprep.subr.bf16.mxu0 %v2586_v36 }
  0xc3   : > { %2336 = vmatpush3.bf16.msra.mxu1 %v2585_v35 }
  0xc4   : > { %2337 = vmatprep.subr.bf16.mxu1 %v2588_v38 }
  0xc5   : > { %2316 = vmatpush3.bf16.msra.mxu0 %v2587_v37 }
  0xc6   : > { %2317 = vmatprep.subr.bf16.mxu0 %v2590_v40 }
  0xc7   : > { %2338 = vmatpush3.bf16.msra.mxu1 %v2589_v39 }
  0xc8   : > { %2339 = vmatprep.subr.bf16.mxu1 %v2592_v42 }
  0xc9   : > { %2318 = vmatpush3.bf16.msra.mxu0 %v2591_v41 }
  0xca   : > { %1650 = vmatprep.subr.bf16.mxu0 %v2846_v48 }
  0xcb   : > { %2340 = vmatpush3.bf16.msra.mxu1 %v2595_v46 }
  0xcc   : > { %1603 = vmatmul.mubr.bf16.vlgmr.msra.gmra.mxu0 %v2125_v44  ;;  %2365 = vmatprep.subr.bf16.mxu1 %v2847_v7 }
  0xcd   : > { %1651 = vmatpush1.bf16.msra.mxu0 %v2598_v50  ;;  %2194 = vmatprep.mubr.msk.bf16.mxu0 %vm1522_vm0, %v2130_v57 }
  0xce   : > { %1652 = vmatprep.subr.bf16.mxu0 %v2846_v48  ;;  %1643 = vmatmul.mubr.bf16.vlgmr.msra.gmra.mxu1 %v2127_v51 }
  0xcf   : > { %2366 = vmatpush3.bf16.msra.mxu1 %v2615_v6  ;;  %2381 = vmatprep.mubr.msk.bf16.mxu1 %vm2848_vm2, %v2847_v7 }
  0xd0   : > { %2367 = vmatprep.subr.bf16.mxu1 %v2847_v7 }
  0xd1   : > { %1653 = vmatpush1.bf16.msra.mxu0 %v2599_v52 }
  0xd2   : > { %1654 = vmatprep.subr.bf16.mxu0 %v2846_v48 }
  0xd3   : > { %2368 = vmatpush3.bf16.msra.mxu1 %v2616_v8 }
  0xd4   : > { %2369 = vmatprep.subr.bf16.mxu1 %v2847_v7 }
  0xd5   : > { %1655 = vmatpush1.bf16.msra.mxu0 %v2600_v53 }
  0xd6   : > { %1656 = vmatprep.subr.bf16.mxu0 %v2846_v48 }
  0xd7   : > { %2370 = vmatpush3.bf16.msra.mxu1 %v2617_v9 }
  0xd8   : > { %2371 = vmatprep.subr.bf16.mxu1 %v2847_v7 }
  0xd9   : > { %1657 = vmatpush1.bf16.msra.mxu0 %v2601_v54 }
  0xda   : > { %1658 = vmatprep.subr.bf16.mxu0 %v2846_v48 }
  0xdb   : > { %2372 = vmatpush3.bf16.msra.mxu1 %v2618_v10 }
  0xdc   : > { %2373 = vmatprep.subr.bf16.mxu1 %v2847_v7 }
  0xdd   : > { %1659 = vmatpush1.bf16.msra.mxu0 %v2602_v56 }
  0xde   : > { %1660 = vmatprep.subr.bf16.mxu0 %v2846_v48 }
  0xdf   : > { %2374 = vmatpush3.bf16.msra.mxu1 %v2619_v11 }
  0xe0   : > { %2375 = vmatprep.subr.bf16.mxu1 %v2847_v7 }
  0xe1   : > { %1661 = vmatpush1.bf16.msra.mxu0 %v2603_v58  ;;  %v2623_v58 = vld [vmem:[#allocation9 + $0x38] sm:$0xff]  }
  0xe2   : > { %1662 = vmatprep.subr.bf16.mxu0 %v2846_v48 }
  0xe3   : > { %2376 = vmatpush3.bf16.msra.mxu1 %v2620_v12  ;;  %v2211_v12 = vld [vmem:[#allocation12] ss:$0 sm:$0xff] }
  0xe4   : > { %2377 = vmatprep.subr.bf16.mxu1 %v2847_v7 }
  0xe5   : > { %1663 = vmatpush1.bf16.msra.mxu0 %v2604_v59 }
  0xe6   : > { %1664 = vmatprep.subr.bf16.mxu0 %v2846_v48 }
  0xe7   : > { %2378 = vmatpush3.bf16.msra.mxu1 %v2621_v13 }
  0xe8   : > { %2379 = vmatprep.subr.bf16.mxu1 %v2847_v7 }
  0xe9   : > { %1665 = vmatpush1.bf16.msra.mxu0 %v2605_v60 }
  0xea   : > { %1668 = vmatprep.subr.bf16.mxu0 %v2846_v48 }
  0xeb   : > { %2380 = vmatpush3.bf16.msra.mxu1 %v2622_v14 }
  0xec   : > { %2385 = vmatprep.subr.bf16.mxu1 %v2847_v7 }
  0xed   : > { %1669 = vmatpush2.bf16.msra.mxu0 %v1528_v62  ;;  %v2625_v62 = vld [vmem:[#allocation9 + $0x28] sm:$0xff]  }
  0xee   : > { %1670 = vmatprep.subr.bf16.mxu0 %v2846_v48 }
  0xf1   : > { %1671 = vmatpush2.bf16.msra.mxu0 %v2607_v63  ;;  %v2626_v63 = vld [vmem:[#allocation9 + $0x20] sm:$0xff]  }
  0xf2   : > { %1672 = vmatprep.subr.bf16.mxu0 %v2846_v48 }
  0xf5   : > { %1673 = vmatpush2.bf16.msra.mxu0 %v2608_v0  ;;  %v2627_v0 = vld [vmem:[#allocation9 + $0x18] sm:$0xff]  }
  0xf6   : > { %1674 = vmatprep.subr.bf16.mxu0 %v2846_v48 }
  0xf9   : > { %1675 = vmatpush2.bf16.msra.mxu0 %v2609_v1  ;;  %v2628_v1 = vld [vmem:[#allocation9 + $0x10] sm:$0xff]  }
  0xfa   : > { %1676 = vmatprep.subr.bf16.mxu0 %v2846_v48 }
  0xfd   : > { %1677 = vmatpush2.bf16.msra.mxu0 %v2610_v2  ;;  %v2629_v2 = vld [vmem:[#allocation9 + $0x8] sm:$0xff]  }
  0xfe   : > { %1678 = vmatprep.subr.bf16.mxu0 %v2846_v48 }
 0x101   : > { %1679 = vmatpush2.bf16.msra.mxu0 %v2611_v3  ;;  %v2630_v3 = vld [vmem:[#allocation9] sm:$0xff]  }
 0x102   : > { %1680 = vmatprep.subr.bf16.mxu0 %v2846_v48 }
 0x105   : > { %1681 = vmatpush2.bf16.msra.mxu0 %v2612_v4 }
 0x108   : > { %1683 = vmatmul.mubr.bf16.vlgmr.msra.gmra.mxu0 %v2129_v5 }
 0x14c   : > { %v2231_v15 = vpop.f32.mrf.mxu0 }
 0x14e   : > { %v2232_v17 = vpop.f32.mrf.mxu0  ;;  %v2253_v18 = vpop.f32.mrf.mxu1 }
 0x14f   : > { %v2233_v19 = vadd.f32 %v2232_v17, %v2231_v15 }
 0x150   : > { %v2234_v20 = vpop.f32.mrf.mxu0  ;;  %v2254_v21 = vpop.f32.mrf.mxu1 }
 0x151   : > { %v898_v22 = vadd.f32 %v2233_v19, %v2067_v16  ;;  %v2255_v23 = vadd.f32 %v2254_v21, %v2253_v18 }
 0x152   : > { %v2235_v24 = vpop.f32.mrf.mxu0  ;;  %v2256_v25 = vpop.f32.mrf.mxu1 }
 0x153   : > { %v938_v26 = vadd.f32 %v2255_v23, %v898_v22 }
 0x154   : > { %v2257_v27 = vpop.f32.mrf.mxu1 }
 0x16c   : > { %v2275_v28 = vpop.f32.mrf.mxu0 }
 0x16e   : > { %v2276_v29 = vpop.f32.mrf.mxu0  ;;  %v2297_v32 = vpop.f32.mrf.mxu1 }
 0x16f   : > { %v2277_v30 = vadd.f32 %v2276_v29, %v2275_v28 }
 0x170   : > { %v2278_v31 = vpop.f32.mrf.mxu0  ;;  %v2298_v35 = vpop.f32.mrf.mxu1 }
 0x171   : > { %v978_v33 = vadd.f32 %v2277_v30, %v938_v26  ;;  %v2299_v36 = vadd.f32 %v2298_v35, %v2297_v32 }
 0x172   : > { %v2279_v34 = vpop.f32.mrf.mxu0  ;;  %v2300_v37 = vpop.f32.mrf.mxu1 }
 0x173   : > { %v1565_v48 = vadd.f32 %v2299_v36, %v2122_v47  ;;  %v983_v4 = vmax.f32 %v978_v33, 0.0 }
 0x174   : > { %v2301_v38 = vpop.f32.mrf.mxu1 }
 0x175   : > { %v1691_v5 = vpack.c.bf16 %v983_v4, %v983_v4 }
 0x18c   : > { %v2319_v39 = vpop.f32.mrf.mxu0 }
 0x18e   : > { %v2320_v40 = vpop.f32.mrf.mxu0  ;;  %v2341_v41 = vpop.f32.mrf.mxu1 }
 0x18f   : > { %v2321_v49 = vadd.f32 %v2320_v40, %v2319_v39 }
 0x190   : > { %v2322_v42 = vpop.f32.mrf.mxu0  ;;  %v2342_v43 = vpop.f32.mrf.mxu1 }
 0x191   : > { %v1605_v50 = vadd.f32 %v2321_v49, %v1565_v48  ;;  %v2343_v51 = vadd.f32 %v2342_v43, %v2341_v41 }
 0x192   : > { %v2323_v44 = vpop.f32.mrf.mxu0  ;;  %v2344_v45 = vpop.f32.mrf.mxu1 }
 0x193   : > { %v1645_v52 = vadd.f32 %v2343_v51, %v1605_v50 }
 0x194   : > { %v2345_v46 = vpop.f32.mrf.mxu1 }
 0x1c8   : > { %v1684_v53 = vpop.f32.mrf.mxu0 }
 0x1c9   : > { %v1685_v54 = vadd.f32 %v1684_v53, %v1645_v52 }
 0x1ca   : > { %v1686_v55 = vpop.f32.mrf.mxu0 }
 0x1cb   : > { %v1690_v56 = vmax.f32 %v1685_v54, 0.0 }
 0x1cc   : > { %v1687_v57 = vpop.f32.mrf.mxu0 }
 0x1cd   : > { %v1708_v59 = vpack.c.bf16 %v1690_v56, %v1690_v56 }
 0x1ce   : > { %v1688_v60 = vpop.f32.mrf.mxu0 }
 0x1cf   : > { %2382 = vmatmul.mubr.bf16.vlgmr.msra.gmra.mxu1 %v1708_v59 }
 0x1d0   : > { %2386 = vmatpush3.bf16.msra.mxu1 %v2623_v58  ;;  %2401 = vmatprep.mubr.msk.bf16.mxu1 %vm2848_vm2, %v2847_v7 }
 0x1d1   : > { %2387 = vmatprep.subr.bf16.mxu1 %v2847_v7 }
 0x1d4   : > { %2388 = vmatpush3.bf16.msra.mxu1 %v2624_v61 }
 0x1d5   : > { %2389 = vmatprep.subr.bf16.mxu1 %v2847_v7 }
 0x1d8   : > { %2390 = vmatpush3.bf16.msra.mxu1 %v2625_v62 }
 0x1d9   : > { %2391 = vmatprep.subr.bf16.mxu1 %v2847_v7 }
 0x1dc   : > { %2392 = vmatpush3.bf16.msra.mxu1 %v2626_v63 }
 0x1dd   : > { %2393 = vmatprep.subr.bf16.mxu1 %v2847_v7 }
 0x1e0   : > { %2394 = vmatpush3.bf16.msra.mxu1 %v2627_v0 }
 0x1e1   : > { %2395 = vmatprep.subr.bf16.mxu1 %v2847_v7 }
 0x1e4   : > { %2396 = vmatpush3.bf16.msra.mxu1 %v2628_v1 }
 0x1e5   : > { %2397 = vmatprep.subr.bf16.mxu1 %v2847_v7 }
 0x1e8   : > { %2398 = vmatpush3.bf16.msra.mxu1 %v2629_v2 }
 0x1e9   : > { %2399 = vmatprep.subr.bf16.mxu1 %v2847_v7 }
 0x1ec   : > { %2400 = vmatpush3.bf16.msra.mxu1 %v2630_v3 }
 0x1ef   : > { %2402 = vmatmul.mubr.bf16.vlgmr.msra.gmra.mxu1 %v1691_v5 }
 0x28f   : > { %v1807_v6 = vpop.f32.mrf.mxu1 }
 0x291   : > { %v2383_v8 = vpop.f32.mrf.mxu1 }
 0x293   : > { %v1810_v9 = vpop.f32.mrf.mxu1 }
 0x295   : > { %v2384_v10 = vpop.f32.mrf.mxu1 }
 0x2af   : > { %v1895_v11 = vpop.f32.mrf.mxu1 }
 0x2b0   : > { %v1896_v13 = vadd.f32 %v1895_v11, %v1807_v6 }
 0x2b1   : > { %v2403_v14 = vpop.f32.mrf.mxu1 }
 0x2b2   : > { %v1908_v15 = vadd.f32 %v2211_v12, %v1896_v13 }
 0x2b3   : > { %v1898_v16 = vpop.f32.mrf.mxu1 }
 0x2b4   : > { %1909 = vst [vmem:[%s446_s10] sm:$0xff] %v1908_v15 }
 0x2b5   : > { %v2404_v7 = vpop.f32.mrf.mxu1 }
 0x2b6 PF: > { %s23_s30 = sadd.s32 1, %s2835_s30  }
 0x2b7   : > { %p20_p3 = scmp.ge.s32.totalorder %s23_s30, 4  }
 0x2b9   :  { %22 = sbr.rel (!%p20_p3) target bundleno = 4 (0x4), region = 118 }
 0x2be   :  { %1929 = vsyncpa [#allocation3], 1 }
 0x2bf   :  { %1931 = vsyncpa [#allocation3 + $0x1], 1 }
 0x2c0   :  { %1932 = vsyncpa [#allocation5], 1 }
 0x2c1   :  { %1933 = vsyncpa [#allocation8], 1 }
 0x2c2   :  { %1934 = vsyncpa [#allocation11], 1 }

</bundles_post_ra>
